<compile_context>
chip_gen: v7x
topology: tpu7x:2x2x1
jax: 0.10.0
libtpu: 0.0.40
codegen_flags: <defaults>
</compile_context>

<pallas_src>
import functools

import jax
import jax.numpy as jnp
from jax.experimental import pallas as pl
from jax.experimental.pallas import tpu as pltpu

EPS = 1e-6


def _cosine_kernel(x1_ref, x2_ref, o_ref, *, inv_total, eps):
    # x1_ref/x2_ref blocks: (1, C, TS); o_ref block: (1, 1, 1)
    s = pl.program_id(1)

    x1 = x1_ref[0]                                           # (C, TS), lane-dense
    x2 = x2_ref[0]

    dot = jnp.sum(x1 * x2, axis=0, keepdims=True)            # (1, TS)
    n1 = jnp.sqrt(jnp.sum(x1 * x1, axis=0, keepdims=True))   # (1, TS)
    n2 = jnp.sqrt(jnp.sum(x2 * x2, axis=0, keepdims=True))   # (1, TS)
    denom = jnp.maximum(n1, eps) * jnp.maximum(n2, eps)
    cos = dot / denom                                        # (1, TS)

    partial = jnp.sum(cos, axis=1, keepdims=True).reshape(1, 1, 1)

    @pl.when(s == 0)
    def _():
        o_ref[...] = jnp.zeros((1, 1, 1), jnp.float32)

    o_ref[...] = o_ref[...] + partial

    @pl.when(s == pl.num_programs(1) - 1)
    def _():
        o_ref[...] = o_ref[...] * inv_total                  # mean over all S positions


def adversial_supervised_cosine(x1, x2, *, block_s=None, eps=EPS):
    """x1, x2: (B, C, *spatial). Returns (B,) mean cosine similarity, like the PyTorch module."""
    assert x1.shape == x2.shape, (x1.shape, x2.shape)
    B, C = int(x1.shape[0]), int(x1.shape[1])
    S = 1
    for d in x1.shape[2:]:
        S *= int(d)

    x1f = jnp.reshape(x1, (B, C, S)).astype(jnp.float32)     # free reshape, no transpose
    x2f = jnp.reshape(x2, (B, C, S)).astype(jnp.float32)

    # Pick the spatial tile: largest lane-aligned divisor of S (or the full axis if
    # S is not a multiple of 128 — full-extent blocks are always legal).
    if block_s is None:
        block_s = S
        if S % 128 == 0:
            for cand in (2048, 1024, 512, 256, 128):
                if S % cand == 0:
                    block_s = cand
                    break
    assert S % block_s == 0, (S, block_s)
    num_s = S // block_s

    kernel = functools.partial(_cosine_kernel, inv_total=1.0 / float(S), eps=float(eps))

    out = pl.pallas_call(
        kernel,
        out_shape=jax.ShapeDtypeStruct((B, 1, 1), jnp.float32),
        grid=(B, num_s),
        in_specs=[
            pl.BlockSpec((1, C, block_s), lambda b, s: (b, 0, s)),
            pl.BlockSpec((1, C, block_s), lambda b, s: (b, 0, s)),
        ],
        out_specs=pl.BlockSpec((1, 1, 1), lambda b, s: (b, 0, 0)),
        compiler_params=pltpu.CompilerParams(
            dimension_semantics=("parallel", "arbitrary")),
    )(x1f, x2f)
    return out.reshape(B)


def reference(x1, x2, eps=EPS):
    # Pure-JAX mirror of the PyTorch forward (permute to (B, S, C), cosine over C, mean over S).
    B, C = x1.shape[0], x1.shape[1]
    a = jnp.reshape(x1, (B, C, -1)).transpose(0, 2, 1).astype(jnp.float32)
    b = jnp.reshape(x2, (B, C, -1)).transpose(0, 2, 1).astype(jnp.float32)
    dot = jnp.sum(a * b, axis=2)
    n1 = jnp.maximum(jnp.sqrt(jnp.sum(a * a, axis=2)), eps)
    n2 = jnp.maximum(jnp.sqrt(jnp.sum(b * b, axis=2)), eps)
    return (dot / (n1 * n2)).mean(axis=1)


if __name__ == "__main__":
    key = jax.random.PRNGKey(0)
    k1, k2 = jax.random.split(key)
    B, C, H, W = 2, 4, 16, 16
    x1 = jax.random.normal(k1, (B, C, H, W), jnp.float32)
    x2 = jax.random.normal(k2, (B, C, H, W), jnp.float32)

    # Exercise both the multi-spatial-tile accumulation path and the single-tile path.
    out_tiled = adversial_supervised_cosine(x1, x2, block_s=128)
    jax.block_until_ready(out_tiled)
    out_full = adversial_supervised_cosine(x1, x2)
    jax.block_until_ready(out_full)

    ref = reference(x1, x2)
    assert out_tiled.shape == (B,), out_tiled.shape
    assert jnp.allclose(out_tiled, ref, atol=1e-5, rtol=1e-4), float(jnp.max(jnp.abs(out_tiled - ref)))
    assert jnp.allclose(out_full, ref, atol=1e-5, rtol=1e-4), float(jnp.max(jnp.abs(out_full - ref)))
    print("KERNEL_OK")
</pallas_src>

<mosaic_0001>
module attributes {stable_mosaic.version = 11 : i64} {
  func.func @_cosine_kernel(%arg0: i32, %arg1: i32, %arg2: memref<1x4x128xf32, #tpu.memory_space<vmem>>, %arg3: memref<1x4x128xf32, #tpu.memory_space<vmem>>, %arg4: memref<1x1x1xf32, #tpu.memory_space<vmem>>) attributes {dimension_semantics = [#tpu.dimension_semantics<parallel>, #tpu.dimension_semantics<arbitrary>], iteration_bounds = array<i64: 2, 2>, scalar_prefetch = 0 : i64, scratch_operands = 0 : i64, tpu.core_type = #tpu.core_type<tc>, window_params = [{transform_indices = @transform_0, window_bounds = array<i64: 1, 4, 128>}, {transform_indices = @transform_1, window_bounds = array<i64: 1, 4, 128>}, {transform_indices = @transform_2, window_bounds = array<i64: 1, 1, 1>}]} {
    %c0 = arith.constant 0 : index
    %c0_0 = arith.constant 0 : index
    %c0_1 = arith.constant 0 : index
    %0 = vector.load %arg2[%c0, %c0_0, %c0_1] : memref<1x4x128xf32, #tpu.memory_space<vmem>>, vector<1x4x128xf32>
    %1 = vector.shape_cast %0 : vector<1x4x128xf32> to vector<4x128xf32>
    %c0_2 = arith.constant 0 : index
    %c0_3 = arith.constant 0 : index
    %c0_4 = arith.constant 0 : index
    %2 = vector.load %arg3[%c0_2, %c0_3, %c0_4] : memref<1x4x128xf32, #tpu.memory_space<vmem>>, vector<1x4x128xf32>
    %3 = vector.shape_cast %2 : vector<1x4x128xf32> to vector<4x128xf32>
    %4 = arith.mulf %1, %3 : vector<4x128xf32>
    %cst = arith.constant dense<0.000000e+00> : vector<128xf32>
    %5 = vector.multi_reduction <add>, %4, %cst [0] : vector<4x128xf32> to vector<128xf32>
    %6 = vector.shape_cast %5 : vector<128xf32> to vector<1x128xf32>
    %7 = arith.mulf %1, %1 : vector<4x128xf32>
    %cst_5 = arith.constant dense<0.000000e+00> : vector<128xf32>
    %8 = vector.multi_reduction <add>, %7, %cst_5 [0] : vector<4x128xf32> to vector<128xf32>
    %9 = vector.shape_cast %8 : vector<128xf32> to vector<1x128xf32>
    %10 = math.sqrt %9 : vector<1x128xf32>
    %11 = arith.mulf %3, %3 : vector<4x128xf32>
    %cst_6 = arith.constant dense<0.000000e+00> : vector<128xf32>
    %12 = vector.multi_reduction <add>, %11, %cst_6 [0] : vector<4x128xf32> to vector<128xf32>
    %13 = vector.shape_cast %12 : vector<128xf32> to vector<1x128xf32>
    %14 = math.sqrt %13 : vector<1x128xf32>
    %cst_7 = arith.constant 9.99999997E-7 : f32
    %15 = vector.broadcast %cst_7 : f32 to vector<1x128xf32>
    %16 = arith.maximumf %10, %15 : vector<1x128xf32>
    %cst_8 = arith.constant 9.99999997E-7 : f32
    %17 = vector.broadcast %cst_8 : f32 to vector<1x128xf32>
    %18 = arith.maximumf %14, %17 : vector<1x128xf32>
    %19 = arith.mulf %16, %18 : vector<1x128xf32>
    %20 = arith.divf %6, %19 : vector<1x128xf32>
    %cst_9 = arith.constant dense<0.000000e+00> : vector<1xf32>
    %21 = vector.multi_reduction <add>, %20, %cst_9 [1] : vector<1x128xf32> to vector<1xf32>
    %22 = vector.shape_cast %21 : vector<1xf32> to vector<1x1xf32>
    %23 = vector.shape_cast %22 : vector<1x1xf32> to vector<1x1x1xf32>
    %c0_i32 = arith.constant 0 : i32
    %24 = arith.cmpi eq, %arg1, %c0_i32 : i32
    %25 = arith.extui %24 : i1 to i32
    %c0_i32_10 = arith.constant 0 : i32
    %26 = arith.cmpi ne, %25, %c0_i32_10 : i32
    scf.if %26 {
      %cst_18 = arith.constant 0.000000e+00 : f32
      %33 = vector.broadcast %cst_18 : f32 to vector<1x1x1xf32>
      %c0_19 = arith.constant 0 : index
      %c0_20 = arith.constant 0 : index
      %c0_21 = arith.constant 0 : index
      %34 = vector.load %arg4[%c0_19, %c0_20, %c0_21] : memref<1x1x1xf32, #tpu.memory_space<vmem>>, vector<1x1x1xf32>
      tpu.vector_store %arg4[%c0_19, %c0_20, %c0_21], %33 {strides = array<i32>} : memref<1x1x1xf32, #tpu.memory_space<vmem>>, vector<1x1x1xf32>,
    } else {
    }
    %c0_11 = arith.constant 0 : index
    %c0_12 = arith.constant 0 : index
    %c0_13 = arith.constant 0 : index
    %27 = vector.load %arg4[%c0_11, %c0_12, %c0_13] : memref<1x1x1xf32, #tpu.memory_space<vmem>>, vector<1x1x1xf32>
    %28 = arith.addf %27, %23 : vector<1x1x1xf32>
    %c0_14 = arith.constant 0 : index
    %c0_15 = arith.constant 0 : index
    %c0_16 = arith.constant 0 : index
    %29 = vector.load %arg4[%c0_14, %c0_15, %c0_16] : memref<1x1x1xf32, #tpu.memory_space<vmem>>, vector<1x1x1xf32>
    tpu.vector_store %arg4[%c0_14, %c0_15, %c0_16], %28 {strides = array<i32>} : memref<1x1x1xf32, #tpu.memory_space<vmem>>, vector<1x1x1xf32>,
    %c1_i32 = arith.constant 1 : i32
    %30 = arith.cmpi eq, %arg1, %c1_i32 : i32
    %31 = arith.extui %30 : i1 to i32
    %c0_i32_17 = arith.constant 0 : i32
    %32 = arith.cmpi ne, %31, %c0_i32_17 : i32
    scf.if %32 {
      %c0_18 = arith.constant 0 : index
      %c0_19 = arith.constant 0 : index
      %c0_20 = arith.constant 0 : index
      %33 = vector.load %arg4[%c0_18, %c0_19, %c0_20] : memref<1x1x1xf32, #tpu.memory_space<vmem>>, vector<1x1x1xf32>
      %cst_21 = arith.constant 3.906250e-03 : f32
      %34 = vector.broadcast %cst_21 : f32 to vector<1x1x1xf32>
      %35 = arith.mulf %33, %34 : vector<1x1x1xf32>
      %c0_22 = arith.constant 0 : index
      %c0_23 = arith.constant 0 : index
      %c0_24 = arith.constant 0 : index
      %36 = vector.load %arg4[%c0_22, %c0_23, %c0_24] : memref<1x1x1xf32, #tpu.memory_space<vmem>>, vector<1x1x1xf32>
      tpu.vector_store %arg4[%c0_22, %c0_23, %c0_24], %35 {strides = array<i32>} : memref<1x1x1xf32, #tpu.memory_space<vmem>>, vector<1x1x1xf32>,
    } else {
    }
    return
  }
  func.func @transform_0(%arg0: i32, %arg1: i32) -> (i32, i32, i32) {
    %c0_i32 = arith.constant 0 : i32
    %c0_i32_0 = arith.constant 0 : i32
    return %arg0, %c0_i32, %arg1 : i32, i32, i32
  }
  func.func @transform_1(%arg0: i32, %arg1: i32) -> (i32, i32, i32) {
    %c0_i32 = arith.constant 0 : i32
    %c0_i32_0 = arith.constant 0 : i32
    return %arg0, %c0_i32, %arg1 : i32, i32, i32
  }
  func.func @transform_2(%arg0: i32, %arg1: i32) -> (i32, i32, i32) {
    %c0_i32 = arith.constant 0 : i32
    %c0_i32_0 = arith.constant 0 : i32
    %c0_i32_1 = arith.constant 0 : i32
    return %arg0, %c0_i32, %c0_i32_0 : i32, i32, i32
  }
}

</mosaic_0001>

<bundles_post_ra>
// kernel: tpu_custom_call.1
= control target key start
LH: loop header
LB: loop body
LE: loop exit
PB: predicated region body
PF: predicated region fallthrough
CT: control target
= control target key end

     0   :  { %7 = vsyncpa [#allocation3], 0  ;;  %s838_s0 = inlined_call_operand.hbm [shape: f32[2,4,256], index: 0, kind: input, shape index: {}]   ;;  %s839_s1 = inlined_call_operand.hbm [shape: f32[2,4,256], index: 1, kind: input, shape index: {}]   ;;  %s840_s2 = inlined_call_operand.vmem [shape: f32[2,1,1], index: 2, kind: output, shape index: {}]  }
   0x1   :  { %9 = vsyncpa [#allocation3 + $0x1], 0 }
   0x2   :  { %10 = vsyncpa [#allocation5], 0 }
   0x3   :  { %12 = vsyncpa [#allocation5 + $0x1], 0  ;;  %s626_s9 = smov 0   ;;  %s628_s10 = smov 0  }
   0x4   :  { %s630_s11 = smov 0   ;;  %s632_s12 = smov 0  }
   0x5   :  { %s634_s13 = smov 0   ;;  %s636_s14 = smov 0  }
   0x6   :  { %s638_s15 = smov 0   ;;  %s640_s16 = smov 0  }
   0x7 LB: > { %s376_s17 = sadd.s32 4294967295, %s606_s16   ;;  %s27_s18 = sadd.s32 1, %s598_s14  ;;  %s606_s16 = sphi %s640_s16, %s18_s16   ;;  %s602_s15 = sphi %s638_s15, %s856_s15   ;;  %s598_s14 = sphi %s636_s14, %s855_s14   ;;  %s594_s13 = sphi %s634_s13, %s854_s13   ;;  %s590_s12 = sphi %s632_s12, %s853_s12   ;;  %s586_s11 = sphi %s630_s11, %s852_s11   ;;  %s582_s10 = sphi %s628_s10, %s851_s10   ;;  %s578_s9 = sphi %s626_s9, %s850_s9  }
   0x8   : > { %p28_p0 = scmp.ge.s32.totalorder %s27_s18, 2  ;;  %s30_s19 = sadd.s32 1, %s602_s15 }
   0x9   : > { %s39_s20 = sadd.s32 1, %s586_s11  ;;  %p46_p1 = scmp.ne.s32.totalorder %s586_s11, %s582_s10 }
   0xa   : > { %s858_s18 = smov (%p28_p0, %s27_s18), 0  ;;  %s860_s19 = smov (!%p28_p0, %s30_s19), %s602_s15 }
   0xb   : > { %s35_s21 = ssub.s32 %s598_s14, %s858_s18  ;;  %p47_p2 = scmp.eq.s32.totalorder %s606_s16, 0 }
   0xc   : > { %p32_p3 = scmp.ge.s32.totalorder %s860_s19, 2  ;;  %p52_p4 = scmp.ne.s32.totalorder %s582_s10, %s578_s9 }
   0xd   : > { %p677_p5 = por %p47_p2, %p46_p1  ;;  %p53_p6 = scmp.eq.s32.totalorder %s376_s17, 0 }
   0xe   : > { %s862_s19 = smov (%p32_p3, %s860_s19), 0  ;;  %p404_p8 = scmp.lt.s32.totalorder %s606_s16, 4 }
   0xf   : > { %p683_p7 = por %p53_p6, %p52_p4  ;;  %s34_s24 = ssub.s32 %s602_s15, %s862_s19 }
  0x10   : > { %s36_s25 = sor.u32 %s35_s21, %s34_s24  ;;  %s691_s26 = sand.u32 1, %s586_s11  }
  0x11   : > { %s843_s23 = scalar_select %p683_p7, 1, 0 }
  0x12   : > { %p37_p9 = scmp.eq.s32.totalorder %s36_s25, 0  ;;  %s380_s27 = sshll.u32 %s691_s26, 2 }
  0x13   : > { %s381_s28 = sshll.u32 %s602_s15, 1  ;;  %s134_s4 = scalar_lea.vmem [#allocation2], %s380_s27 }
  0x14   : > { %s696_s29 = scalar_select %p37_p9, %s586_s11, %s39_s20  }
  0x15   : > { %s699_s30 = sadd.s32 %s598_s14, %s381_s28  ;;  %s143_s5 = sshll.u32 %s134_s4, 4  ;;  %s711_s5 = int_to_ptr.vmem [resolvable:$true] %s143_s5 }
  0x16   : > { %s382_s3 = sshll.u32 %s699_s30, 6  ;;  %p717_p10 = pnand %p404_p8, %p677_p5 }
  0x17   : > { %s709_s8 = scalar_lea.hbm %s838_s0, %s382_s3  ;;  %s131_s17 = scalar_lea.sflag [#allocation3], %s691_s26 }
  0x18   : > { %s476_s20 = scalar_lea.hbm %s709_s8, 64  ;;  %p478_p0 = pneg %p717_p10 }
  0x19   : > { %p477_p13 = scmp.ne.s32.totalorder %s709_s8, %s476_s20  ;;  %s481_s24 = scalar_lea.hbm %s838_s0, 256 }
  0x1a   : > { %p482_p3 = scmp.lt.u32.totalorder %s709_s8, %s838_s0  ;;  %p483_p4 = scmp.lt.u32.totalorder %s481_s24, %s476_s20 }
  0x1b   : > { %p479_p1 = pnand %p478_p0, %p477_p13  ;;  %p485_p6 = scmp.lt.u32.totalorder %s476_s20, %s709_s8 }
  0x1c   : > { %p484_p5 = por %p483_p4, %p482_p3 }
  0x1d   : > { %p480_p2 = pneg %p479_p1 }
  0x1e   : > { %p486_p8 = por %p485_p6, %p484_p5 }
  0x20   : > { %p487_p9 = pnand %p486_p8, %p480_p2 }
  0x22   : > { %490 = shalt.err (!%p487_p9)
}
  0x23   : > { %s491_s4 = scalar_lea.vmem %s711_s5, 64  ;;  %s608_s6 = smov [#allocation2]  }
  0x24   : > { %p492_p13 = scmp.ne.s32.totalorder %s711_s5, %s491_s4  ;;  %s496_s7 = sshll.u32 %s608_s6, 4  ;;  %s497_s7 = int_to_ptr.vmem [resolvable:$false] %s496_s7 }
  0x25   : > { %s498_s21 = scalar_lea.vmem %s497_s7, 128  ;;  %p499_p12 = scmp.lt.s32.totalorder %s711_s5, %s497_s7 }
  0x26   : > { %p494_p1 = pnand %p492_p13, %p478_p0  ;;  %p500_p3 = scmp.lt.s32.totalorder %s498_s21, %s491_s4 }
  0x28   : > { %p495_p11 = pneg %p494_p1  ;;  %p501_p4 = por %p500_p3, %p499_p12 }
  0x2a   : > { %p502_p5 = pnand %p501_p4, %p495_p11 }
  0x2c   : > { %505 = shalt.err (!%p502_p5)
}
  0x2d   : > { %400 = dma.hbm_to_vmem [thread:$0]  (!%p717_p10), %s709_s8, 64, %s711_s5, %s131_s17  }
  0x2e   : > { %p845_p2 = scmp.lt.s32.totalorder %s606_s16, 5  ;;  %p846_p6 = scmp.ge.s32.totalorder %s606_s16, 1 }
  0x2f   : > { %s762_s25 = scalar_lea.hbm %s839_s1, %s382_s3  ;;  %s154_s28 = scalar_lea.vmem [#allocation4], %s380_s27 }
  0x30   : > { %p753_p8 = pnand %p846_p6, %p845_p2  ;;  %s163_s4 = sshll.u32 %s154_s28, 4  ;;  %s164_s4 = int_to_ptr.vmem [resolvable:$true] %s163_s4 }
  0x31   : > { %s151_s5 = scalar_lea.sflag [#allocation5], %s691_s26  ;;  %s506_s8 = scalar_lea.hbm %s762_s25, 64 }
  0x32   : > { %s847_s20 = scalar_select %p753_p8, 1, 0 }
  0x33   : > { %p507_p11 = scmp.ne.s32.totalorder %s762_s25, %s506_s8  ;;  %s511_s3 = scalar_lea.hbm %s839_s1, 256 }
  0x34   : > { %p512_p13 = scmp.lt.u32.totalorder %s762_s25, %s839_s1  ;;  %p513_p1 = scmp.lt.u32.totalorder %s511_s3, %s506_s8 }
  0x35   : > { %p509_p12 = pnand %p507_p11, %p478_p0  ;;  %p515_p4 = scmp.lt.u32.totalorder %s506_s8, %s762_s25 }
  0x36   : > { %p514_p3 = por %p513_p1, %p512_p13 }
  0x37   : > { %p510_p9 = pneg %p509_p12 }
  0x38   : > { %p516_p5 = por %p515_p4, %p514_p3 }
  0x3a   : > { %p517_p2 = pnand %p516_p5, %p510_p9 }
  0x3c   : > { %520 = shalt.err (!%p517_p2)
}
  0x3d   : > { %s521_s26 = scalar_lea.vmem %s164_s4, 64  ;;  %s609_s27 = smov [#allocation4]  }
  0x3e   : > { %p522_p6 = scmp.ne.s32.totalorder %s164_s4, %s521_s26  ;;  %s526_s21 = sshll.u32 %s609_s27, 4  ;;  %s527_s21 = int_to_ptr.vmem [resolvable:$false] %s526_s21 }
  0x3f   : > { %s528_s22 = scalar_lea.vmem %s527_s21, 128  ;;  %p529_p7 = scmp.lt.s32.totalorder %s164_s4, %s527_s21 }
  0x40   : > { %p524_p11 = pnand %p522_p6, %p478_p0  ;;  %p530_p8 = scmp.lt.s32.totalorder %s528_s22, %s521_s26 }
  0x42   : > { %p525_p12 = pneg %p524_p11  ;;  %p531_p1 = por %p530_p8, %p529_p7 }
  0x44   : > { %p532_p13 = pnand %p531_p1, %p525_p12 }
  0x46   : > { %535 = shalt.err (!%p532_p13)
}
  0x47   : > { %403 = dma.hbm_to_vmem [thread:$0]  (!%p717_p10), %s762_s25, 64, %s164_s4, %s151_s5  }
  0x48   : > { %p848_p9 = scmp.ne.s32.totalorder %s847_s20, 0 }
  0x49   : > { %s174_s24 = sand.u32 (!%p848_p9), 1, %s582_s10   ;;  %p849_p0 = scmp.ne.s32.totalorder (!%p848_p9), %s843_s23, 0 }
  0x4a   : > { %172 = sbr.rel (%p848_p9) target bundleno = 289 (0x121), region = 28  ;;  %s387_s28 = sshll.u32 (!%p848_p9), %s174_s24, 2 }
  0x4b   : > { %s175_s8 = scalar_lea.sflag (!%p848_p9), [#allocation3], %s174_s24  ;;  %s178_s30 = scalar_lea.vmem (!%p848_p9), [#allocation2], %s387_s28 }
  0x51   : > { %569 = dma.done.wait (%p849_p0), %s175_s8, 64  }
  0x52   : > { %571 = vsyncadd (%p849_p0), %s175_s8, 4294967232  ;;  %s184_s17 = scalar_lea.sflag [#allocation5], %s174_s24  ;;  %s187_s3 = scalar_lea.vmem [#allocation4], %s387_s28 }
  0x53   : > { %573 = dma.done.wait (%p849_p0), %s184_s17, 64  }
  0x54   : > { %575 = vsyncadd (%p849_p0), %s184_s17, 4294967232  ;;  %p211_p7 = scmp.lt.s32.totalorder %s594_s13, 1  ;;  %v214_v0 = vld [vmem:[%s178_s30] sm:$0xf]  ;;  %v215_v1 = vld [vmem:[%s187_s3] sm:$0xf] }
  0x55   : > { %vm217_vm0 = vcmask 1043456   ;;  %v225_v2 = vmul.f32 %v214_v0, %v214_v0  ;;  %v240_v3 = vmul.f32 %v215_v1, %v215_v1  ;;  %v216_v18 = vmul.f32 %v215_v1, %v214_v0  ;;  %p389_p10 = scmp.ne.s32.totalorder %s590_s12, 0 }
  0x56   : > { %s864_s13 = smov (!%p211_p7, %s594_s13), 1  ;;  %vm266_vm5 = vcmask (!%p389_p10), 0   ;;  %v610_v42 = vmov (!%p389_p10), 0.0  }
  0x57   : > { %s802_s25 = scalar_lea.vmem %s840_s2, %s864_s13  ;;  %v226_v4 = vsel %vm217_vm0, %v225_v2, 0.0  ;;  %v241_v5 = vsel %vm217_vm0, %v240_v3, 0.0  ;;  %v218_v19 = vsel %vm217_vm0, %v216_v18, 0.0 }
  0x58   : > { %v227_v6 = vrot.slane %v226_v4, 4  ;;  %v242_v7 = vrot.slane %v241_v5, 4  ;;  %v219_v20 = vrot.slane %v218_v19, 4  ;;  %267 = vst.msk [vmem:[%s802_s25] sm:$0x1] (!%p389_p10), %vm266_vm5, %v610_v42 }
  0x5a   : > { %v228_v8 = vadd.f32 %v227_v6, %v226_v4  ;;  %v243_v9 = vadd.f32 %v242_v7, %v241_v5  ;;  %v220_v22 = vadd.f32 %v219_v20, %v218_v19 }
  0x5c   : > { %v229_v10 = vrot.slane %v228_v8, 2  ;;  %v244_v11 = vrot.slane %v243_v9, 2  ;;  %v221_v31 = vrot.slane %v220_v22, 2 }
  0x5e   : > { %v230_v12 = vadd.f32 %v229_v10, %v228_v8  ;;  %v245_v13 = vadd.f32 %v244_v11, %v243_v9  ;;  %v222_v36 = vadd.f32 %v221_v31, %v220_v22 }
  0x60   : > { %v231_v14 = vrot.slane %v230_v12, 1  ;;  %v246_v15 = vrot.slane %v245_v13, 1  ;;  %v223_v37 = vrot.slane %v222_v36, 1 }
  0x62   : > { %v232_v16 = vadd.f32 %v231_v14, %v230_v12  ;;  %v247_v17 = vadd.f32 %v246_v15, %v245_v13  ;;  %v224_v38 = vadd.f32 %v223_v37, %v222_v36 }
  0x64   : > { %470 = vrsqrt.f32 %v232_v16  ;;  %vm235_vm1 = vcmp.eq.f32.partialorder %v232_v16, inf  ;;  %v238_v23 = vand.u32 2147483648, %v232_v16  ;;  %vm237_vm2 = vcmp.eq.f32.partialorder %v232_v16, 0.0 }
  0x65   : > { %472 = vrsqrt.f32 %v247_v17  ;;  %vm250_vm3 = vcmp.eq.f32.partialorder %v247_v17, inf  ;;  %v253_v26 = vand.u32 2147483648, %v247_v17  ;;  %vm252_vm4 = vcmp.eq.f32.partialorder %v247_v17, 0.0 }
  0x6e   : > { %v471_v21 = vpop.eup %470 }
  0x6f   : > { %v473_v24 = vpop.eup %472  ;;  %v234_v25 = vmul.f32 %v471_v21, %v232_v16 }
  0x70   : > { %v249_v27 = vmul.f32 %v473_v24, %v247_v17 }
  0x71   : > { %v236_v28 = vsel %vm235_vm1, %v232_v16, %v234_v25 }
  0x72   : > { %v239_v29 = vsel %vm237_vm2, %v238_v23, %v236_v28  ;;  %v251_v30 = vsel %vm250_vm3, %v247_v17, %v249_v27 }
  0x73   : > { %v254_v32 = vsel %vm252_vm4, %v253_v26, %v251_v30  ;;  %v255_v33 = vmax.f32 %v239_v29, 1e-06 }
  0x74   : > { %v256_v34 = vmax.f32 %v254_v32, 1e-06 }
  0x76   : > { %v257_v35 = vmul.f32 %v256_v34, %v255_v33 }
  0x78   : > { %474 = vrcp.f32 %v257_v35 }
  0x82   : > { %v475_v39 = vpop.eup %474 }
  0x83   : > { %v259_v40 = vmul.f32 %v475_v39, %v224_v38 }
  0x85   : > { %260 = vadd.xlane.f32.xlu0 %v259_v40 }
 0x10c   : > { %265 = sbr.rel (%p389_p10) target bundleno = 275 (0x113), region = 40 }
 0x112   : > { %v261_v41 = vpop.xlane.xlu0 %260 }
 0x113 PF: > { %v268_v43 = vld [vmem:[%s802_s25] sm:$0x1]  ;;  %vm270_vm6 = vcmask 0   ;;  %p390_p8 = scmp.ne.s32.totalorder %s590_s12, 1 }
 0x114   : > { %v269_v44 = vadd.f32 %v268_v43, %v261_v41 }
 0x115   : > { %275 = sbr.rel (%p390_p8) target bundleno = 289 (0x121), region = 44 }
 0x116   : > { %271 = vst.msk [vmem:[%s802_s25] sm:$0x1] %vm270_vm6, %v269_v44 }
 0x11d   : > { %v276_v45 = vld [vmem:[%s802_s25] sm:$0x1] }
 0x11e   : > { %v277_v46 = vmul.f32 0.00390625, %v276_v45 }
 0x120   : > { %278 = vst.msk [vmem:[%s802_s25] sm:$0x1] %vm270_vm6, %v277_v46 }
 0x121 PF: > { %s18_s16 = sadd.s32 1, %s606_s16   ;;  %s850_s9 = smov %s582_s10 }
 0x122   : > { %p15_p3 = scmp.ge.s32.totalorder %s18_s16, 6   ;;  %s851_s10 = smov %s586_s11 }
 0x123   : > { %s852_s11 = smov %s696_s29  ;;  %s853_s12 = smov %s598_s14 }
 0x124   : > { %s854_s13 = smov %s602_s15  ;;  %s855_s14 = smov %s858_s18 }
 0x125   : > { %s856_s15 = smov %s862_s19  ;;  %17 = sbr.rel (!%p15_p3) target bundleno = 7 (0x7), region = 89 }
 0x12c   :  { %296 = vsyncpa [#allocation3], 1 }
 0x12d   :  { %298 = vsyncpa [#allocation3 + $0x1], 1 }
 0x12e   :  { %299 = vsyncpa [#allocation5], 1 }
 0x12f   :  { %301 = vsyncpa [#allocation5 + $0x1], 1 }

</bundles_post_ra>
